<compile_context>
chip_gen: v5e
topology: v5e:2x2
jax: 0.10.0
libtpu: 0.0.40
codegen_flags: <defaults>
</compile_context>

<pallas_src>
import jax
import jax.numpy as jnp
from jax import lax
from jax.experimental import pallas as pl
from jax.experimental.pallas import tpu as pltpu

LANE = 128
SUBLANE = 8


def _round_up(x, m):
    return (x + m - 1) // m * m


def conv_bn_relu_kernel(patches_ref, w_ref, shift_ref, out_ref):
    """One M-tile of fused Conv2d(+bias) + BatchNorm2d(eval) + ReLU.

    patches_ref : (TILE_M, K_p)    bf16  im2col rows (zero padded along K)
    w_ref       : (K_p, Cout_p)    bf16  conv weights with BN scale folded in
    shift_ref   : (1, Cout_p)      f32   conv bias + BN shift folded together
    out_ref     : (TILE_M, Cout_p) f32
    """
    acc = jnp.dot(patches_ref[...], w_ref[...],
                  preferred_element_type=jnp.float32)          # MXU, f32 accumulate
    y = acc + shift_ref[...]                                   # folded bias/BN shift
    out_ref[...] = jnp.maximum(y, 0.0).astype(out_ref.dtype)   # ReLU


def conv_module(x_nchw, w_oihw, conv_bias, bn_gamma, bn_beta, bn_mean, bn_var,
                *, stride=2, padding=0, eps=1e-5, tile_m=512):
    """Eval-mode Conv_Module forward: Dropout(identity) -> Conv2d -> BN -> ReLU."""
    N, Cin, H, W = x_nchw.shape
    Cout, _, KH, KW = w_oihw.shape
    Ho = (H + 2 * padding - KH) // stride + 1
    Wo = (W + 2 * padding - KW) // stride + 1
    M = N * Ho * Wo

    K = KH * KW * Cin
    K_p = _round_up(K, LANE)
    Cout_p = _round_up(Cout, LANE)

    tile_m = max(SUBLANE, min(_round_up(tile_m, SUBLANE), _round_up(M, SUBLANE)))
    Mp = _round_up(M, tile_m)

    # ---- im2col in NHWC (wrapper-side layout plumbing, no compute) ----------
    # patches[m, (kh*KW + kw)*Cin + c] = x[n, stride*i - pad + kh, stride*j - pad + kw, c]
    x_nhwc = jnp.transpose(x_nchw, (0, 2, 3, 1)).astype(jnp.bfloat16)
    if padding:
        x_nhwc = jnp.pad(
            x_nhwc, ((0, 0), (padding, padding), (padding, padding), (0, 0)))
    slices = []
    for kh in range(KH):
        for kw in range(KW):
            slices.append(x_nhwc[:, kh:kh + stride * (Ho - 1) + 1:stride,
                                 kw:kw + stride * (Wo - 1) + 1:stride, :])
    patches = jnp.stack(slices, axis=3).reshape(M, K)            # (M, KH*KW*Cin) bf16
    patches = jnp.pad(patches, ((0, Mp - M), (0, K_p - K)))      # zero pad rows / K

    # ---- fold eval-mode BatchNorm (and the conv bias) into the matmul -------
    scale = bn_gamma / jnp.sqrt(bn_var + eps)                    # (Cout,)
    shift = bn_beta + scale * (conv_bias - bn_mean)              # (Cout,)
    w_mat = jnp.transpose(w_oihw, (2, 3, 1, 0)).reshape(K, Cout)  # (kh,kw,Cin,Cout)
    w_mat = w_mat.astype(jnp.float32) * scale[None, :]
    w_mat = jnp.pad(w_mat, ((0, K_p - K), (0, Cout_p - Cout))).astype(jnp.bfloat16)
    shift_pad = jnp.pad(shift, (0, Cout_p - Cout)).reshape(1, Cout_p).astype(jnp.float32)

    # VMEM budget: double-buffered patches/output tiles + resident weights/shift.
    est = (2 * tile_m * K_p * 2            # patches tile (bf16), 2 buffers
           + 2 * tile_m * Cout_p * 4       # output tile (f32), 2 buffers
           + K_p * Cout_p * 2 + Cout_p * 4)
    vmem_limit = int(min(64 << 20, max(16 << 20, 2 * est)))

    out_flat = pl.pallas_call(
        conv_bn_relu_kernel,
        out_shape=jax.ShapeDtypeStruct((Mp, Cout_p), jnp.float32),
        grid=(Mp // tile_m,),
        in_specs=[pl.BlockSpec((tile_m, K_p), lambda i: (i, 0)),
                  pl.BlockSpec((K_p, Cout_p), lambda i: (0, 0)),
                  pl.BlockSpec((1, Cout_p), lambda i: (0, 0))],
        out_specs=pl.BlockSpec((tile_m, Cout_p), lambda i: (i, 0)),
        compiler_params=pltpu.CompilerParams(
            dimension_semantics=("parallel",),
            vmem_limit_bytes=vmem_limit),
    )(patches, w_mat, shift_pad)

    # Back to PyTorch's NCHW layout (a real NHWC consumer could skip this).
    return out_flat[:M, :Cout].reshape(N, Ho, Wo, Cout).transpose(0, 3, 1, 2)


def reference(x, w, b, gamma, beta, mean, var, *, stride=2, padding=0, eps=1e-5):
    conv = lax.conv_general_dilated(
        x, w, window_strides=(stride, stride),
        padding=[(padding, padding), (padding, padding)],
        dimension_numbers=('NCHW', 'OIHW', 'NCHW'))
    conv = conv + b.reshape(1, -1, 1, 1)
    bn = ((conv - mean.reshape(1, -1, 1, 1))
          / jnp.sqrt(var.reshape(1, -1, 1, 1) + eps)
          * gamma.reshape(1, -1, 1, 1) + beta.reshape(1, -1, 1, 1))
    return jnp.maximum(bn, 0.0)


if __name__ == "__main__":
    N, Cin, Cout, H, W = 2, 4, 8, 16, 16
    STRIDE, PAD = 2, 0

    key = jax.random.PRNGKey(0)
    kx, kw, kb, kg, kbe, km, kv = jax.random.split(key, 7)

    x = jax.random.normal(kx, (N, Cin, H, W), dtype=jnp.float32)
    w = 0.1 * jax.random.normal(kw, (Cout, Cin, 3, 3), dtype=jnp.float32)
    b = 0.1 * jax.random.normal(kb, (Cout,), dtype=jnp.float32)
    gamma = 1.0 + 0.1 * jax.random.normal(kg, (Cout,), dtype=jnp.float32)
    beta = 0.1 * jax.random.normal(kbe, (Cout,), dtype=jnp.float32)
    mean = 0.05 * jax.random.normal(km, (Cout,), dtype=jnp.float32)
    var = 0.5 + 0.5 * jnp.abs(jax.random.normal(kv, (Cout,), dtype=jnp.float32))

    # tile_m=64 exercises the multi-tile (grid > 1) pipelined path at toy sizes.
    out = conv_module(x, w, b, gamma, beta, mean, var,
                      stride=STRIDE, padding=PAD, tile_m=64)
    out = jax.block_until_ready(out)

    ref = jax.block_until_ready(
        reference(x, w, b, gamma, beta, mean, var, stride=STRIDE, padding=PAD))
    Ho = (H + 2 * PAD - 3) // STRIDE + 1
    Wo = (W + 2 * PAD - 3) // STRIDE + 1
    assert out.shape == (N, Cout, Ho, Wo), out.shape
    # bf16 inputs / f32 accumulation -> slightly relaxed tolerance.
    assert jnp.allclose(out, ref, atol=3e-2, rtol=3e-2), float(jnp.max(jnp.abs(out - ref)))

    print("KERNEL_OK")
</pallas_src>

<mosaic_0001>
module attributes {stable_mosaic.version = 11 : i64} {
  func.func @conv_bn_relu_kernel(%arg0: i32, %arg1: memref<64x128xbf16, #tpu.memory_space<vmem>>, %arg2: memref<128x128xbf16, #tpu.memory_space<vmem>>, %arg3: memref<1x128xf32, #tpu.memory_space<vmem>>, %arg4: memref<64x128xf32, #tpu.memory_space<vmem>>) attributes {dimension_semantics = [#tpu.dimension_semantics<parallel>], iteration_bounds = array<i64: 2>, scalar_prefetch = 0 : i64, scratch_operands = 0 : i64, tpu.core_type = #tpu.core_type<tc>, window_params = [{transform_indices = @transform_0, window_bounds = array<i64: 64, 128>}, {pipeline_mode = #tpu.pipeline_mode<synchronous>, transform_indices = @transform_1, window_bounds = array<i64: 128, 128>}, {pipeline_mode = #tpu.pipeline_mode<synchronous>, transform_indices = @transform_2, window_bounds = array<i64: 1, 128>}, {transform_indices = @transform_3, window_bounds = array<i64: 64, 128>}]} {
    %c0 = arith.constant 0 : index
    %c0_0 = arith.constant 0 : index
    %0 = vector.load %arg1[%c0, %c0_0] : memref<64x128xbf16, #tpu.memory_space<vmem>>, vector<64x128xbf16>
    %c0_1 = arith.constant 0 : index
    %c0_2 = arith.constant 0 : index
    %1 = vector.load %arg2[%c0_1, %c0_2] : memref<128x128xbf16, #tpu.memory_space<vmem>>, vector<128x128xbf16>
    %cst = arith.constant dense<0.000000e+00> : vector<64x128xf32>
    %2 = tpu.matmul %0, %1, %cst {dimension_numbers = #tpu.dot_dimension_numbers<[1], [0], [0], [1], [0, 0, 1, 1], [], []>} : vector<64x128xbf16>, vector<128x128xbf16>, vector<64x128xf32> -> vector<64x128xf32>
    %c0_3 = arith.constant 0 : index
    %c0_4 = arith.constant 0 : index
    %3 = vector.load %arg3[%c0_3, %c0_4] : memref<1x128xf32, #tpu.memory_space<vmem>>, vector<1x128xf32>
    %4 = vector.broadcast %3 : vector<1x128xf32> to vector<64x128xf32>
    %5 = arith.addf %2, %4 : vector<64x128xf32>
    %cst_5 = arith.constant 0.000000e+00 : f32
    %6 = vector.broadcast %cst_5 : f32 to vector<64x128xf32>
    %7 = arith.maximumf %5, %6 : vector<64x128xf32>
    %c0_6 = arith.constant 0 : index
    %c0_7 = arith.constant 0 : index
    %8 = vector.load %arg4[%c0_6, %c0_7] : memref<64x128xf32, #tpu.memory_space<vmem>>, vector<64x128xf32>
    tpu.vector_store %arg4[%c0_6, %c0_7], %7 {strides = array<i32>} : memref<64x128xf32, #tpu.memory_space<vmem>>, vector<64x128xf32>,
    return
  }
  func.func @transform_0(%arg0: i32) -> (i32, i32) {
    %c0_i32 = arith.constant 0 : i32
    %c0_i32_0 = arith.constant 0 : i32
    return %arg0, %c0_i32 : i32, i32
  }
  func.func @transform_1(%arg0: i32) -> (i32, i32) {
    %c0_i32 = arith.constant 0 : i32
    %c0_i32_0 = arith.constant 0 : i32
    %c0_i32_1 = arith.constant 0 : i32
    return %c0_i32, %c0_i32_0 : i32, i32
  }
  func.func @transform_2(%arg0: i32) -> (i32, i32) {
    %c0_i32 = arith.constant 0 : i32
    %c0_i32_0 = arith.constant 0 : i32
    %c0_i32_1 = arith.constant 0 : i32
    return %c0_i32, %c0_i32_0 : i32, i32
  }
  func.func @transform_3(%arg0: i32) -> (i32, i32) {
    %c0_i32 = arith.constant 0 : i32
    %c0_i32_0 = arith.constant 0 : i32
    return %arg0, %c0_i32 : i32, i32
  }
}

</mosaic_0001>

<bundles_post_ra>
// kernel: tpu_custom_call.1
= control target key start
LH: loop header
LB: loop body
LE: loop exit
PB: predicated region body
PF: predicated region fallthrough
CT: control target
= control target key end

     0   :  { %8 = vsyncpa [#allocation3], 0  ;;  %s940_s0 = inlined_call_operand.hbm [shape: bf16[128,128], index: 0, kind: input, shape index: {}]   ;;  %s941_s1 = inlined_call_operand.hbm [shape: bf16[128,128], index: 1, kind: input, shape index: {}]   ;;  %s942_s2 = inlined_call_operand.vmem [shape: f32[1,128], index: 2, kind: input, shape index: {}]   ;;  %s943_s3 = inlined_call_operand.hbm [shape: f32[128,128], index: 3, kind: output, shape index: {}]  }
   0x1   :  { %10 = vsyncpa [#allocation3 + $0x1], 0 }
   0x2   :  { %11 = vsyncpa [#allocation6], 0 }
   0x3   :  { %12 = vsyncpa [#allocation4], 0 }
   0x4   :  { %14 = vsyncpa [#allocation4 + $0x1], 0  ;;  %s775_s12 = smov 0   ;;  %s777_s13 = smov 0  }
   0x5   :  { %s779_s14 = smov 0   ;;  %s781_s15 = smov 0  }
   0x6 LB: > { %s796_s16 = sadd.s32 4294967295, %s748_s15   ;;  %s454_s17 = sadd.s32 4294967294, %s748_s15   ;;  %s748_s15 = sphi %s781_s15, %s953_s15   ;;  %s744_s14 = sphi %s779_s14, %s952_s14   ;;  %s740_s13 = sphi %s777_s13, %s951_s13   ;;  %s736_s12 = sphi %s775_s12, %s950_s12  }
   0x7   : > { %p40_p0 = scmp.ne.s32.totalorder %s740_s13, %s736_s12  ;;  %p41_p1 = scmp.eq.s32.totalorder %s796_s16, 0 }
   0x8   : > { %p106_p2 = scmp.eq.s32.totalorder %s796_s16, 1  ;;  %p112_p3 = scmp.eq.s32.totalorder %s454_s17, 1 }
   0x9   : > { %p805_p4 = por %p41_p1, %p40_p0  ;;  %p455_p5 = scmp.ge.s32.totalorder %s748_s15, 1 }
   0xa   : > { %p810_p6 = por %p112_p3, %p40_p0  ;;  %p119_p7 = scmp.lt.s32.totalorder %s748_s15, 3 }
   0xb   : > { %s130_s22 = sshll.u32 %s941_s1, 4  ;;  %s750_s24 = smov [#allocation5]   ;;  %s131_s22 = int_to_ptr.hbm [resolvable:$true] %s130_s22 }
   0xc   : > { %p818_p8 = pnand %p455_p5, %p119_p7  ;;  %s132_s25 = sshll.u32 %s750_s24, 4  ;;  %s133_s25 = int_to_ptr.vmem [resolvable:$true] %s132_s25 }
   0xd   : > { %s828_s26 = sadd.s32 1, %s748_s15   ;;  %s751_s27 = smov 64  }
   0xe   : > { %p564_p9 = pneg %p818_p8  ;;  %s752_s28 = smov 4  }
   0xf   : > { %s24_s29 = ssub.s32 %s748_s15, %s828_s26  ;;  %s27_s30 = sadd.s32 1, %s744_s14 }
  0x10   : > { %p565_p10 = pnand %p564_p9, %p41_p1  ;;  %p25_p12 = scmp.eq.s32.totalorder %s24_s29, 0 }
  0x11   : > { %p34_p13 = scmp.ne.s32.totalorder %s744_s14, %s740_s13  ;;  %p35_p0 = scmp.eq.s32.totalorder %s748_s15, 0 }
  0x12   : > { %567 = dma.hbm_to_vmem [thread:$0]  (!%p565_p10), %s131_s22, 1024, %s133_s25, [#allocation6], %s751_s27, %s751_s27, %s752_s28  }
  0x13   : > { %s840_s4 = scalar_select %p25_p12, %s744_s14, %s27_s30  }
  0x14   : > { %p844_p3 = por %p106_p2, %p34_p13  ;;  %p577_p5 = scmp.lt.s32.totalorder %s748_s15, 2 }
  0x15   : > { %s149_s6 = sand.u32 1, %s744_s14   ;;  %s518_s7 = sshll.u32 %s748_s15, 5 }
  0x16   : > { %p36_p7 = por %p35_p0, %p34_p13  ;;  %s458_s8 = sshll.u32 %s149_s6, 5 }
  0x17   : > { %s158_s11 = scalar_lea.hbm %s940_s0, %s518_s7  ;;  %s153_s20 = scalar_lea.vmem [#allocation2], %s458_s8 }
  0x18   : > { %s159_s17 = sshll.u32 %s158_s11, 4  ;;  %s161_s21 = sshll.u32 %s153_s20, 4  ;;  %s160_s17 = int_to_ptr.hbm [resolvable:$true] %s159_s17  ;;  %s162_s21 = int_to_ptr.vmem [resolvable:$true] %s161_s21 }
  0x19   : > { %p854_p9 = pnand %p577_p5, %p36_p7  ;;  %s150_s24 = scalar_lea.sflag [#allocation3], %s149_s6 }
  0x1a   : > { %s648_s25 = sshra.s32 %s160_s17, 4  ;;  %s655_s8 = scalar_lea.hbm %s940_s0, 64  ;;  %s649_s25 = int_to_ptr.hbm [resolvable:$true] %s648_s25 }
  0x1b   : > { %s650_s29 = scalar_lea.hbm %s649_s25, 32  ;;  %p652_p10 = pneg %p854_p9 }
  0x1c   : > { %p651_p2 = scmp.ne.s32.totalorder %s649_s25, %s650_s29  ;;  %p656_p0 = scmp.lt.s32.totalorder %s649_s25, %s940_s0 }
  0x1d   : > { %p657_p5 = scmp.lt.s32.totalorder %s655_s8, %s650_s29 }
  0x1e   : > { %p653_p12 = pnand %p652_p10, %p651_p2 }
  0x1f   : > { %p658_p7 = por %p657_p5, %p656_p0 }
  0x20   : > { %p654_p13 = pneg %p653_p12 }
  0x22   : > { %p659_p11 = pnand %p658_p7, %p654_p13 }
  0x24   : > { %662 = shalt.err (!%p659_p11)
}
  0x25   : > { %571 = dma.hbm_to_vmem [thread:$0]  (!%p854_p9), %s160_s17, 512, %s162_s21, %s150_s24, %s751_s27, %s751_s27, %s752_s28  }
  0x26   : > { %173 = sbr.rel (%p818_p8) target bundleno = 228 (0xe4), region = 32  ;;  %s874_s6 = sand.u32 (!%p818_p8), 1, %s740_s13  }
  0x27   : > { %s462_s11 = sshll.u32 (!%p818_p8), %s874_s6, 5  ;;  %s176_s20 = scalar_lea.sflag (!%p818_p8), [#allocation3], %s874_s6 }
  0x28   : > { %s878_s25 = scalar_lea.vmem (!%p818_p8), [#allocation2], %s462_s11 }
  0x2b   : > { %723 = dma.done.wait (%p805_p4), %s176_s20, 512  }
  0x2c   : > { %725 = vsyncadd (%p805_p4), %s176_s20, 4294966784 }
  0x2d   : > { %727 = dma.done.wait (%p41_p1), [#allocation6], 1024  }
  0x2e   : > { %729 = vsyncadd (%p41_p1), [#allocation6], 4294966272  ;;  %v530_v0 = vld [vmem:[#allocation5 + $0x38] sm:$0xff]  ;;  %v529_v1 = vld [vmem:[#allocation5 + $0x30] sm:$0xff]  ;;  %s464_s27 = sshll.u32 %s874_s6, 6  ;;  %s531_s17 = sshll.u32 %s796_s16, 6 }
  0x2f   : > { %310 = vmatpush.bf16.msra.mxu0 %v530_v0  ;;  %532 = vmatpush.bf16.msra.mxu1 %v530_v0  ;;  %v528_v2 = vld [vmem:[#allocation5 + $0x28] sm:$0xff]  ;;  %v527_v3 = vld [vmem:[#allocation5 + $0x20] sm:$0xff]  ;;  %v526_v4 = vld [vmem:[#allocation5 + $0x18] sm:$0xff]  ;;  %s896_s28 = scalar_lea.vmem [#allocation7], %s464_s27  ;;  %s367_s24 = scalar_lea.hbm %s943_s3, %s531_s17 }
  0x30   : > { %533 = vmatpush.bf16.msra.mxu2 %v530_v0  ;;  %534 = vmatpush.bf16.msra.mxu3 %v530_v0  ;;  %v525_v5 = vld [vmem:[#allocation5 + $0x10] sm:$0xff]  ;;  %v524_v6 = vld [vmem:[#allocation5 + $0x8] sm:$0xff]  ;;  %v523_v7 = vld [vmem:[#allocation5] sm:$0xff]  ;;  %s368_s29 = sshll.u32 %s896_s28, 4  ;;  %s370_s16 = sshll.u32 %s367_s24, 4  ;;  %s369_s29 = int_to_ptr.vmem [resolvable:$true] %s368_s29  ;;  %s371_s16 = int_to_ptr.hbm [resolvable:$true] %s370_s16 }
  0x31   : > { %v519_v8 = vld [vmem:[%s878_s25] sm:$0xff]  ;;  %v520_v9 = vld [vmem:[%s878_s25 + $0x8] sm:$0xff]  ;;  %v521_v10 = vld [vmem:[%s878_s25 + $0x10] sm:$0xff]  ;;  %s356_s30 = scalar_lea.sflag [#allocation4], %s874_s6  ;;  %s692_s7 = sshra.s32 %s371_s16, 4  ;;  %s693_s7 = int_to_ptr.hbm [resolvable:$true] %s692_s7 }
  0x32   : > { %v522_v11 = vld [vmem:[%s878_s25 + $0x18] sm:$0xff]  ;;  %v617_v12 = vld [vmem:[%s942_s2] ss:$0 sm:$0xff]  ;;  %s694_s8 = scalar_lea.hbm %s693_s7, 64  ;;  %s698_s11 = scalar_lea.hbm %s943_s3, 128 }
  0x33   : > { %311 = vmatpush.bf16.msra.mxu0 %v529_v1  ;;  %535 = vmatpush.bf16.msra.mxu1 %v529_v1  ;;  %p695_p1 = scmp.ne.s32.totalorder %s693_s7, %s694_s8  ;;  %p699_p11 = scmp.lt.s32.totalorder %s693_s7, %s943_s3 }
  0x34   : > { %536 = vmatpush.bf16.msra.mxu2 %v529_v1  ;;  %537 = vmatpush.bf16.msra.mxu3 %v529_v1  ;;  %p700_p9 = scmp.lt.s32.totalorder %s698_s11, %s694_s8 }
  0x35   : > { %p696_p4 = pnand %p695_p1, %p844_p3 }
  0x36   : > { %p701_p2 = por %p700_p9, %p699_p11 }
  0x37   : > { %312 = vmatpush.bf16.msra.mxu0 %v528_v2  ;;  %538 = vmatpush.bf16.msra.mxu1 %v528_v2  ;;  %p697_p8 = pneg %p696_p4 }
  0x38   : > { %539 = vmatpush.bf16.msra.mxu2 %v528_v2  ;;  %540 = vmatpush.bf16.msra.mxu3 %v528_v2 }
  0x39   : > { %p702_p10 = pnand %p701_p2, %p697_p8 }
  0x3b   : > { %313 = vmatpush.bf16.msra.mxu0 %v527_v3  ;;  %541 = vmatpush.bf16.msra.mxu1 %v527_v3 }
  0x3c   : > { %542 = vmatpush.bf16.msra.mxu2 %v527_v3  ;;  %543 = vmatpush.bf16.msra.mxu3 %v527_v3 }
  0x3f   : > { %314 = vmatpush.bf16.msra.mxu0 %v526_v4  ;;  %544 = vmatpush.bf16.msra.mxu1 %v526_v4 }
  0x40   : > { %545 = vmatpush.bf16.msra.mxu2 %v526_v4  ;;  %546 = vmatpush.bf16.msra.mxu3 %v526_v4 }
  0x43   : > { %315 = vmatpush.bf16.msra.mxu0 %v525_v5  ;;  %547 = vmatpush.bf16.msra.mxu1 %v525_v5 }
  0x44   : > { %548 = vmatpush.bf16.msra.mxu2 %v525_v5  ;;  %549 = vmatpush.bf16.msra.mxu3 %v525_v5 }
  0x47   : > { %316 = vmatpush.bf16.msra.mxu0 %v524_v6  ;;  %550 = vmatpush.bf16.msra.mxu1 %v524_v6 }
  0x48   : > { %551 = vmatpush.bf16.msra.mxu2 %v524_v6  ;;  %552 = vmatpush.bf16.msra.mxu3 %v524_v6 }
  0x4b   : > { %317 = vmatpush.bf16.msra.mxu0 %v523_v7  ;;  %553 = vmatpush.bf16.msra.mxu1 %v523_v7 }
  0x4c   : > { %554 = vmatpush.bf16.msra.mxu2 %v523_v7  ;;  %555 = vmatpush.bf16.msra.mxu3 %v523_v7 }
  0x4e   : > { %318 = vmatmul.bf16.vlgmr.msra.gmra.mxu0 %v519_v8  ;;  %323 = vmatmul.bf16.vlgmr.msra.gmra.mxu1 %v520_v9 }
  0x4f   : > { %328 = vmatmul.bf16.vlgmr.msra.gmra.mxu2 %v521_v10  ;;  %333 = vmatmul.bf16.vlgmr.msra.gmra.mxu3 %v522_v11 }
  0xcb   : > { %v319_v13 = vpop.f32.mrf.mxu0  ;;  %v324_v14 = vpop.f32.mrf.mxu1 }
  0xcc   : > { %v320_v15 = vadd.f32 %v617_v12, %v319_v13  ;;  %v325_v16 = vadd.f32 %v617_v12, %v324_v14 }
  0xce   : > { %v339_v17 = vmax.f32 %v320_v15, 0.0  ;;  %v341_v18 = vmax.f32 %v325_v16, 0.0 }
  0xd0   : > { %347 = vst [vmem:[%s896_s28] sm:$0xff] %v339_v17 }
  0xd1   : > { %349 = vst [vmem:[%s896_s28 + $0x10] sm:$0xff] %v341_v18 }
  0xd2   : > { %v329_v19 = vpop.f32.mrf.mxu2  ;;  %v334_v20 = vpop.f32.mrf.mxu3 }
  0xd3   : > { %v330_v21 = vadd.f32 %v617_v12, %v329_v19  ;;  %v335_v22 = vadd.f32 %v617_v12, %v334_v20  ;;  %v321_v23 = vpop.f32.mrf.mxu0  ;;  %v326_v24 = vpop.f32.mrf.mxu1 }
  0xd4   : > { %v322_v25 = vadd.f32 %v617_v12, %v321_v23  ;;  %v327_v26 = vadd.f32 %v617_v12, %v326_v24 }
  0xd5   : > { %v343_v27 = vmax.f32 %v330_v21, 0.0  ;;  %v345_v28 = vmax.f32 %v335_v22, 0.0 }
  0xd6   : > { %v340_v29 = vmax.f32 %v322_v25, 0.0  ;;  %v342_v30 = vmax.f32 %v327_v26, 0.0 }
  0xd7   : > { %351 = vst [vmem:[%s896_s28 + $0x20] sm:$0xff] %v343_v27 }
  0xd8   : > { %353 = vst [vmem:[%s896_s28 + $0x30] sm:$0xff] %v345_v28 }
  0xd9   : > { %348 = vst [vmem:[%s896_s28 + $0x8] sm:$0xff] %v340_v29 }
  0xda   : > { %350 = vst [vmem:[%s896_s28 + $0x18] sm:$0xff] %v342_v30  ;;  %v331_v31 = vpop.f32.mrf.mxu2  ;;  %v336_v32 = vpop.f32.mrf.mxu3 }
  0xdb   : > { %v332_v33 = vadd.f32 %v617_v12, %v331_v31  ;;  %v337_v34 = vadd.f32 %v617_v12, %v336_v32 }
  0xdd   : > { %v344_v35 = vmax.f32 %v332_v33, 0.0  ;;  %v346_v36 = vmax.f32 %v337_v34, 0.0 }
  0xdf   : > { %352 = vst [vmem:[%s896_s28 + $0x28] sm:$0xff] %v344_v35 }
  0xe0   : > { %354 = vst [vmem:[%s896_s28 + $0x38] sm:$0xff] %v346_v36 }
  0xe1   : > { %705 = shalt.err (!%p702_p10)
}
  0xe2   : > { %s753_s6 = smov 128   ;;  %s754_s18 = smov 8  }
  0xe3   : > { %562 = dma.vmem_to_hbm [thread:$0]  (%p844_p3), %s369_s29, 1024, %s371_s16, %s356_s30, %s753_s6, %s753_s6, %s754_s18  }
  0xe4 PF: > { %s385_s23 = sand.u32 1, %s736_s12   ;;  %p949_p12 = scmp.ge.s32.totalorder %s748_s15, 2 }
  0xe5   : > { %s386_s27 = scalar_lea.sflag [#allocation4], %s385_s23 }
  0xe6   : > { %p573_p13 = pnand %p949_p12, %p810_p6 }
  0xe8   : > { %p574_p0 = pneg %p573_p13 }
  0xea   : > { %731 = dma.done.wait (%p574_p0), %s386_s27, 1024  }
  0xeb   : > { %733 = vsyncadd (%p574_p0), %s386_s27, 4294966272  ;;  %p17_p5 = scmp.ge.s32.totalorder %s828_s26, 4   ;;  %s950_s12 = smov %s740_s13 }
  0xec   : > { %s951_s13 = smov %s744_s14  ;;  %s952_s14 = smov %s840_s4 }
  0xed   : > { %s953_s15 = smov %s828_s26  ;;  %19 = sbr.rel (!%p17_p5) target bundleno = 6 (0x6), region = 81 }
  0xf2   :  { %392 = vsyncpa [#allocation3], 1 }
  0xf3   :  { %394 = vsyncpa [#allocation3 + $0x1], 1 }
  0xf4   :  { %395 = vsyncpa [#allocation6], 1 }
  0xf5   :  { %396 = vsyncpa [#allocation4], 1 }
  0xf6   :  { %398 = vsyncpa [#allocation4 + $0x1], 1 }

</bundles_post_ra>
